<compile_context>
chip_gen: v7x
topology: tpu7x:2x2x1
jax: 0.10.0
libtpu: 0.0.40
codegen_flags: <defaults>
</compile_context>

<pallas_src>
import jax
import jax.numpy as jnp
from jax.experimental import pallas as pl
from jax.experimental.pallas import tpu as pltpu


def _round_up(a: int, b: int) -> int:
    return (a + b - 1) // b * b


def _tpu_vmem_capacity_bytes() -> int:
    """Best-effort physical VMEM capacity; conservative (v7x-sized) fallback."""
    try:
        info = pltpu.get_tpu_info()
        cap = getattr(info, "vmem_capacity_bytes", None)
        if cap:
            return int(cap)
    except Exception:
        pass
    return 64 * 1024 * 1024


def _is_v5e() -> bool:
    try:
        kind = jax.devices()[0].device_kind.lower()
        return ("v5 lite" in kind) or ("v5e" in kind) or ("v5litepod" in kind)
    except Exception:
        return False


# ----------------------------------------------------------------------------
# Kernel
# ----------------------------------------------------------------------------
def _make_kernel(silu_lowp: bool, precision):
    """Builds the fused kernel.

    Refs (per grid step):
      x_ref     : (tq, p*Cin)        packed-row activation tile
      w1_ref    : (p*Cin, p*H)       block-diagonal Linear1 weight
      b1_ref    : (1, p*H)
      w2c_ref   : (p*H, p*Cout)      block-diagonal Linear2 weight with the
                                     LayerNorm mean-centering folded in
      b2c_ref   : (1, p*Cout)        centered Linear2 bias (f32)
      gamma_ref : (1, p*Cout)        LayerNorm weight (tiled)
      beta_ref  : (1, p*Cout)        LayerNorm bias   (tiled)
      g_ref     : (p*Cout, p*Cout)   block-diagonal averaging matrix (1/Cout)
      o_ref     : (tq, p*Cout)
    """

    def kernel(x_ref, w1_ref, b1_ref, w2c_ref, b2c_ref,
               gamma_ref, beta_ref, g_ref, o_ref):
        x = x_ref[...].astype(w1_ref.dtype)

        # Linear 1 (block-diagonal when lane-packed), f32 accumulation.
        h = jnp.dot(x, w1_ref[...], preferred_element_type=jnp.float32,
                    precision=precision)
        h = h + b1_ref[...].astype(jnp.float32)

        # SiLU.  bf16 path (v6e/v7x, bf16 weights) halves VPU/EUP work;
        # f32 path otherwise (v5e has no bf16 VPU/EUP).
        if silu_lowp:
            h = h.astype(w2c_ref.dtype)
            h = h * jax.nn.sigmoid(h)
        else:
            h = h * jax.nn.sigmoid(h)
            h = h.astype(w2c_ref.dtype)

        # Dropout(p=0.0) in the reference module is the identity -> no-op.

        # Linear 2 with the LayerNorm mean-centering folded into the weights:
        # centered = (h @ W2 + b2) @ (I - 1/Cout) == h @ W2c + b2c  (exact).
        centered = jnp.dot(h, w2c_ref[...], preferred_element_type=jnp.float32,
                           precision=precision)
        centered = centered + b2c_ref[...].astype(jnp.float32)

        # Per-original-row variance via the block-diagonal averaging matrix:
        # the MXU does the cross-lane reduction and broadcasts it back to every
        # lane of the group, keeping the pipeline lane-dense.
        var = jnp.dot(centered * centered, g_ref[...],
                      preferred_element_type=jnp.float32)

        out = centered * jax.lax.rsqrt(var + 1e-5)       # eps matches PyTorch LN
        out = out * gamma_ref[...].astype(jnp.float32) \
                  + beta_ref[...].astype(jnp.float32)
        o_ref[...] = out.astype(o_ref.dtype)

    return kernel


# ----------------------------------------------------------------------------
# Parameter packing (hoist this out of the per-call hot path)
# ----------------------------------------------------------------------------
def _pack_params(w1, b1, w2, b2, gamma, beta, *, p):
    """Builds lane-packed, block-diagonal parameters and folds the LayerNorm
    mean-centering into Linear2.  Call once per parameter set (not per forward)."""
    cin, hidden = w1.shape
    cout = w2.shape[1]

    # Centering projection: y - mean(y) == y @ (I - 1/Cout).  Folding it into
    # W2/b2 is exact (keeps the centered formulation, no E[y^2]-mean^2 rewrite).
    c = jnp.eye(cout, dtype=jnp.float32) - jnp.full((cout, cout), 1.0 / cout,
                                                    dtype=jnp.float32)
    w2c = (w2.astype(jnp.float32) @ c).astype(w2.dtype)
    b2c = b2.astype(jnp.float32) @ c                      # keep f32

    if p > 1:
        w1_p = jnp.kron(jnp.eye(p, dtype=w1.dtype), w1)   # block-diagonal
        w2c_p = jnp.kron(jnp.eye(p, dtype=w2c.dtype), w2c)
    else:
        w1_p, w2c_p = w1, w2c

    b1_p = jnp.tile(b1, p).reshape(1, p * hidden)
    b2c_p = jnp.tile(b2c, p).reshape(1, p * cout).astype(jnp.float32)
    gamma_p = jnp.tile(gamma, p).reshape(1, p * cout)
    beta_p = jnp.tile(beta, p).reshape(1, p * cout)
    g = jnp.kron(jnp.eye(p, dtype=jnp.float32),
                 jnp.full((cout, cout), 1.0 / cout, dtype=jnp.float32))

    return dict(p=p, cin=cin, hidden=hidden, cout=cout,
                w1=w1_p, b1=b1_p, w2c=w2c_p, b2c=b2c_p,
                gamma=gamma_p, beta=beta_p, g=g)


# ----------------------------------------------------------------------------
# One pallas_call on a 2-D activation whose row count is divisible by p
# ----------------------------------------------------------------------------
def _feature_encoder_2d(x2d, params, *, block_rows, precision):
    p = params["p"]
    cin, hidden, cout = params["cin"], params["hidden"], params["cout"]
    m = x2d.shape[0]
    assert m % p == 0
    mq = m // p
    cin_p, hid_p, cout_p = p * cin, p * hidden, p * cout

    xq = x2d.reshape(mq, cin_p)                   # free row-major reshape

    x_bytes = jnp.dtype(x2d.dtype).itemsize
    w_bytes = jnp.dtype(params["w1"].dtype).itemsize
    out_bytes = x_bytes

    # ---- row-tile selection (packed rows per grid step) ---------------------
    tq = max(8, (block_rows // p) // 8 * 8)       # multiple of 8 sublanes
    tq = min(tq, _round_up(mq, 8))                # don't exceed the input
    # Megacore / 2-TC load balance: when rows are plentiful (each of 4 steps
    # still gets >=512 packed rows, i.e. >=256 KiB tile) aim for >=4 roughly
    # even grid steps; otherwise keep at least 2 steps.
    if mq >= 4 * 512:
        tq = min(tq, _round_up(pl.cdiv(mq, 4), 8))
    elif mq >= 16:
        tq = min(tq, _round_up(pl.cdiv(mq, 2), 8))

    def vmem_est(t):
        tiles = 2 * t * (cin_p * x_bytes + cout_p * out_bytes)        # dbl-buffered IO
        weights = (2 * w_bytes * (cin_p * hid_p + hid_p * cout_p)     # W1, W2c
                   + 2 * 4 * cout_p * cout_p                           # G
                   + 8 * 4 * (cout_p + hid_p))                         # bias / LN vectors
        interm = 4 * t * (hid_p + 3 * cout_p)                         # f32 temporaries
        return tiles + weights + interm + (1 << 20)                   # + slack

    # Generation-aware VMEM budget: 64 MiB parts (v7x) stay conservative,
    # 128 MiB parts (v5e/v6e) get a much larger budget -> bigger tiles.
    vmem_cap = _tpu_vmem_capacity_bytes()
    if vmem_cap >= 96 * 1024 * 1024:
        budget, limit_cap = 64 * 1024 * 1024, 100 * 1024 * 1024
    else:
        budget, limit_cap = 26 * 1024 * 1024, 48 * 1024 * 1024
    while tq > 8 and vmem_est(tq) > budget:
        tq = max(8, (tq // 2) // 8 * 8)
    vmem_limit = int(min(limit_cap, max(32 * 1024 * 1024, 1.5 * vmem_est(tq))))

    grid = (pl.cdiv(mq, tq),)        # ragged last block: handled by Pallas masking

    silu_lowp = (params["w2c"].dtype == jnp.bfloat16) and (not _is_v5e())
    kernel = _make_kernel(silu_lowp, precision)

    out_q = pl.pallas_call(
        kernel,
        out_shape=jax.ShapeDtypeStruct((mq, cout_p), x2d.dtype),
        grid_spec=pltpu.PrefetchScalarGridSpec(
            num_scalar_prefetch=0,
            grid=grid,
            in_specs=[
                pl.BlockSpec((tq, cin_p), lambda i: (i, 0)),        # x tile
                # Constant index maps -> fetched once, stay VMEM-resident.
                pl.BlockSpec((cin_p, hid_p), lambda i: (0, 0)),     # W1 (block-diag)
                pl.BlockSpec((1, hid_p), lambda i: (0, 0)),         # b1
                pl.BlockSpec((hid_p, cout_p), lambda i: (0, 0)),    # W2c (mean-fold)
                pl.BlockSpec((1, cout_p), lambda i: (0, 0)),        # b2c
                pl.BlockSpec((1, cout_p), lambda i: (0, 0)),        # LN gamma
                pl.BlockSpec((1, cout_p), lambda i: (0, 0)),        # LN beta
                pl.BlockSpec((cout_p, cout_p), lambda i: (0, 0)),   # averaging G
            ],
            out_specs=pl.BlockSpec((tq, cout_p), lambda i: (i, 0)),
        ),
        compiler_params=pltpu.CompilerParams(
            dimension_semantics=("parallel",),
            vmem_limit_bytes=vmem_limit),
    )(xq, params["w1"], params["b1"], params["w2c"], params["b2c"],
      params["gamma"], params["beta"], params["g"])

    return out_q.reshape(m, cout)    # undo lane-packing (free, row-major)


# ----------------------------------------------------------------------------
# Public API
# ----------------------------------------------------------------------------
def make_feature_encoder(w1, b1, w2, b2, gamma, beta, *,
                         block_rows=16384, precision=None):
    """Packs parameters ONCE (kron / tile / centering fold hoisted out of the
    hot path) and returns a callable `fwd(x)` suitable for jit."""
    cout = w2.shape[1]
    # Lane-packing factor: pack p original rows per 128-lane wide row.
    p = 128 // cout if (cout < 128 and 128 % cout == 0) else 1

    packed_p = _pack_params(w1, b1, w2, b2, gamma, beta, p=p)
    packed_1 = packed_p if p == 1 else _pack_params(w1, b1, w2, b2, gamma, beta, p=1)

    def fwd(x):
        orig_shape = x.shape
        cin = orig_shape[-1]
        x2d = x.reshape(-1, cin)
        m = x2d.shape[0]

        # Keep the lane-dense path for the bulk of the rows; only the <= p-1
        # remainder rows fall back to the 32-lane (p=1) call.
        m_main = (m // p) * p
        outs = []
        if m_main > 0:
            x_main = x2d if m_main == m else x2d[:m_main]
            outs.append(_feature_encoder_2d(x_main, packed_p,
                                            block_rows=block_rows,
                                            precision=precision))
        if m_main < m:
            outs.append(_feature_encoder_2d(x2d[m_main:], packed_1,
                                            block_rows=block_rows,
                                            precision=precision))
        out2d = outs[0] if len(outs) == 1 else jnp.concatenate(outs, axis=0)
        return out2d.reshape(*orig_shape[:-1], cout)

    return fwd


def feature_encoder(x, w1, b1, w2, b2, gamma, beta, *,
                    block_rows=16384, precision=None):
    """Convenience wrapper.  For repeated calls with fixed parameters prefer
    make_feature_encoder() so the parameter packing is not redone per forward."""
    return make_feature_encoder(w1, b1, w2, b2, gamma, beta,
                                block_rows=block_rows, precision=precision)(x)


def _reference(x, w1, b1, w2, b2, gamma, beta):
    h = x @ w1 + b1
    h = h * jax.nn.sigmoid(h)
    y = h @ w2 + b2
    mean = jnp.mean(y, axis=-1, keepdims=True)
    var = jnp.mean((y - mean) ** 2, axis=-1, keepdims=True)
    return (y - mean) * jax.lax.rsqrt(var + 1e-5) * gamma + beta


if __name__ == "__main__":
    # Small shapes consistent with the module: x is [B, S, Cin].
    B, S = 2, 8
    channels_in, channels_out = 32, 32
    hidden = 2 * channels_out

    key = jax.random.PRNGKey(0)
    kx, kw1, kb1, kw2, kb2, kx2 = jax.random.split(key, 6)

    x = jax.random.normal(kx, (B, S, channels_in), dtype=jnp.float32)

    # Deterministic parameter init (PyTorch-like uniform fan-in scaling).
    lim1 = 1.0 / (channels_in ** 0.5)
    w1 = jax.random.uniform(kw1, (channels_in, hidden), jnp.float32, -lim1, lim1)
    b1 = jax.random.uniform(kb1, (hidden,), jnp.float32, -lim1, lim1)
    lim2 = 1.0 / (hidden ** 0.5)
    w2 = jax.random.uniform(kw2, (hidden, channels_out), jnp.float32, -lim2, lim2)
    b2 = jax.random.uniform(kb2, (channels_out,), jnp.float32, -lim2, lim2)
    gamma = jnp.ones((channels_out,), jnp.float32)     # LayerNorm weight init
    beta = jnp.zeros((channels_out,), jnp.float32)     # LayerNorm bias init

    # Pack parameters once (hoisted out of the hot path), reuse the closure.
    fwd = make_feature_encoder(w1, b1, w2, b2, gamma, beta)

    # 1) Packed (lane-dense) path: B*S = 16 rows, pack factor 4.
    out = jax.block_until_ready(fwd(x))
    ref = _reference(x, w1, b1, w2, b2, gamma, beta)
    assert out.shape == (B, S, channels_out)
    assert jnp.allclose(out, ref, atol=3e-5, rtol=3e-5), (
        "packed path mismatch vs reference: max abs err "
        f"{float(jnp.max(jnp.abs(out - ref)))}")

    # 2) Ragged batch: 15 rows -> 12 rows stay on the lane-dense packed path,
    #    the 3 remainder rows go through the tiny p=1 call.
    x_odd = jax.random.normal(kx2, (3, 5, channels_in), dtype=jnp.float32)
    out_odd = jax.block_until_ready(
        feature_encoder(x_odd, w1, b1, w2, b2, gamma, beta))
    ref_odd = _reference(x_odd, w1, b1, w2, b2, gamma, beta)
    assert out_odd.shape == (3, 5, channels_out)
    assert jnp.allclose(out_odd, ref_odd, atol=3e-5, rtol=3e-5), (
        "ragged/split path mismatch vs reference: max abs err "
        f"{float(jnp.max(jnp.abs(out_odd - ref_odd)))}")

    print("KERNEL_OK")
</pallas_src>

<mosaic_0001>
module attributes {stable_mosaic.version = 11 : i64} {
  func.func @kernel(%arg0: i32, %arg1: memref<8x128xf32, #tpu.memory_space<vmem>>, %arg2: memref<128x256xf32, #tpu.memory_space<vmem>>, %arg3: memref<1x256xf32, #tpu.memory_space<vmem>>, %arg4: memref<256x128xf32, #tpu.memory_space<vmem>>, %arg5: memref<1x128xf32, #tpu.memory_space<vmem>>, %arg6: memref<1x128xf32, #tpu.memory_space<vmem>>, %arg7: memref<1x128xf32, #tpu.memory_space<vmem>>, %arg8: memref<128x128xf32, #tpu.memory_space<vmem>>, %arg9: memref<8x128xf32, #tpu.memory_space<vmem>>) attributes {dimension_semantics = [#tpu.dimension_semantics<parallel>], iteration_bounds = array<i64: 1>, scalar_prefetch = 0 : i64, scratch_operands = 0 : i64, tpu.core_type = #tpu.core_type<tc>, window_params = [{transform_indices = @transform_0, window_bounds = array<i64: 8, 128>}, {pipeline_mode = #tpu.pipeline_mode<synchronous>, transform_indices = @transform_1, window_bounds = array<i64: 128, 256>}, {pipeline_mode = #tpu.pipeline_mode<synchronous>, transform_indices = @transform_2, window_bounds = array<i64: 1, 256>}, {pipeline_mode = #tpu.pipeline_mode<synchronous>, transform_indices = @transform_3, window_bounds = array<i64: 256, 128>}, {pipeline_mode = #tpu.pipeline_mode<synchronous>, transform_indices = @transform_4, window_bounds = array<i64: 1, 128>}, {pipeline_mode = #tpu.pipeline_mode<synchronous>, transform_indices = @transform_5, window_bounds = array<i64: 1, 128>}, {pipeline_mode = #tpu.pipeline_mode<synchronous>, transform_indices = @transform_6, window_bounds = array<i64: 1, 128>}, {pipeline_mode = #tpu.pipeline_mode<synchronous>, transform_indices = @transform_7, window_bounds = array<i64: 128, 128>}, {transform_indices = @transform_8, window_bounds = array<i64: 8, 128>}]} {
    %c0 = arith.constant 0 : index
    %c0_0 = arith.constant 0 : index
    %0 = vector.load %arg1[%c0, %c0_0] : memref<8x128xf32, #tpu.memory_space<vmem>>, vector<8x128xf32>
    %c0_1 = arith.constant 0 : index
    %c0_2 = arith.constant 0 : index
    %1 = vector.load %arg2[%c0_1, %c0_2] : memref<128x256xf32, #tpu.memory_space<vmem>>, vector<128x256xf32>
    %cst = arith.constant dense<0.000000e+00> : vector<8x256xf32>
    %2 = tpu.matmul %0, %1, %cst {dimension_numbers = #tpu.dot_dimension_numbers<[1], [0], [0], [1], [0, 0, 1, 1], [], []>} : vector<8x128xf32>, vector<128x256xf32>, vector<8x256xf32> -> vector<8x256xf32>
    %c0_3 = arith.constant 0 : index
    %c0_4 = arith.constant 0 : index
    %3 = vector.load %arg3[%c0_3, %c0_4] : memref<1x256xf32, #tpu.memory_space<vmem>>, vector<1x256xf32>
    %4 = vector.broadcast %3 : vector<1x256xf32> to vector<8x256xf32>
    %5 = arith.addf %2, %4 : vector<8x256xf32>
    %6 = arith.negf %5 : vector<8x256xf32>
    %7 = math.exp %6 : vector<8x256xf32>
    %cst_5 = arith.constant 1.000000e+00 : f32
    %8 = vector.broadcast %cst_5 : f32 to vector<8x256xf32>
    %9 = arith.addf %8, %7 : vector<8x256xf32>
    %10 = arith.divf %8, %9 : vector<8x256xf32>
    %11 = arith.mulf %5, %10 : vector<8x256xf32>
    %c0_6 = arith.constant 0 : index
    %c0_7 = arith.constant 0 : index
    %12 = vector.load %arg4[%c0_6, %c0_7] : memref<256x128xf32, #tpu.memory_space<vmem>>, vector<256x128xf32>
    %cst_8 = arith.constant dense<0.000000e+00> : vector<8x128xf32>
    %13 = tpu.matmul %11, %12, %cst_8 {dimension_numbers = #tpu.dot_dimension_numbers<[1], [0], [0], [1], [0, 0, 1, 1], [], []>} : vector<8x256xf32>, vector<256x128xf32>, vector<8x128xf32> -> vector<8x128xf32>
    %c0_9 = arith.constant 0 : index
    %c0_10 = arith.constant 0 : index
    %14 = vector.load %arg5[%c0_9, %c0_10] : memref<1x128xf32, #tpu.memory_space<vmem>>, vector<1x128xf32>
    %15 = vector.broadcast %14 : vector<1x128xf32> to vector<8x128xf32>
    %16 = arith.addf %13, %15 : vector<8x128xf32>
    %17 = arith.mulf %16, %16 : vector<8x128xf32>
    %c0_11 = arith.constant 0 : index
    %c0_12 = arith.constant 0 : index
    %18 = vector.load %arg8[%c0_11, %c0_12] : memref<128x128xf32, #tpu.memory_space<vmem>>, vector<128x128xf32>
    %cst_13 = arith.constant dense<0.000000e+00> : vector<8x128xf32>
    %19 = tpu.matmul %17, %18, %cst_13 {dimension_numbers = #tpu.dot_dimension_numbers<[1], [0], [0], [1], [0, 0, 1, 1], [], []>} : vector<8x128xf32>, vector<128x128xf32>, vector<8x128xf32> -> vector<8x128xf32>
    %cst_14 = arith.constant 9.99999974E-6 : f32
    %20 = vector.broadcast %cst_14 : f32 to vector<8x128xf32>
    %21 = arith.addf %19, %20 : vector<8x128xf32>
    %22 = math.rsqrt %21 : vector<8x128xf32>
    %23 = arith.mulf %16, %22 : vector<8x128xf32>
    %c0_15 = arith.constant 0 : index
    %c0_16 = arith.constant 0 : index
    %24 = vector.load %arg6[%c0_15, %c0_16] : memref<1x128xf32, #tpu.memory_space<vmem>>, vector<1x128xf32>
    %25 = vector.broadcast %24 : vector<1x128xf32> to vector<8x128xf32>
    %26 = arith.mulf %23, %25 : vector<8x128xf32>
    %c0_17 = arith.constant 0 : index
    %c0_18 = arith.constant 0 : index
    %27 = vector.load %arg7[%c0_17, %c0_18] : memref<1x128xf32, #tpu.memory_space<vmem>>, vector<1x128xf32>
    %28 = vector.broadcast %27 : vector<1x128xf32> to vector<8x128xf32>
    %29 = arith.addf %26, %28 : vector<8x128xf32>
    %c0_19 = arith.constant 0 : index
    %c0_20 = arith.constant 0 : index
    %30 = vector.load %arg9[%c0_19, %c0_20] : memref<8x128xf32, #tpu.memory_space<vmem>>, vector<8x128xf32>
    tpu.vector_store %arg9[%c0_19, %c0_20], %29 {strides = array<i32>} : memref<8x128xf32, #tpu.memory_space<vmem>>, vector<8x128xf32>,
    return
  }
  func.func @transform_0(%arg0: i32) -> (i32, i32) {
    %c0_i32 = arith.constant 0 : i32
    %c0_i32_0 = arith.constant 0 : i32
    return %arg0, %c0_i32 : i32, i32
  }
  func.func @transform_1(%arg0: i32) -> (i32, i32) {
    %c0_i32 = arith.constant 0 : i32
    %c0_i32_0 = arith.constant 0 : i32
    %c0_i32_1 = arith.constant 0 : i32
    return %c0_i32, %c0_i32_0 : i32, i32
  }
  func.func @transform_2(%arg0: i32) -> (i32, i32) {
    %c0_i32 = arith.constant 0 : i32
    %c0_i32_0 = arith.constant 0 : i32
    %c0_i32_1 = arith.constant 0 : i32
    return %c0_i32, %c0_i32_0 : i32, i32
  }
  func.func @transform_3(%arg0: i32) -> (i32, i32) {
    %c0_i32 = arith.constant 0 : i32
    %c0_i32_0 = arith.constant 0 : i32
    %c0_i32_1 = arith.constant 0 : i32
    return %c0_i32, %c0_i32_0 : i32, i32
  }
  func.func @transform_4(%arg0: i32) -> (i32, i32) {
    %c0_i32 = arith.constant 0 : i32
    %c0_i32_0 = arith.constant 0 : i32
    %c0_i32_1 = arith.constant 0 : i32
    return %c0_i32, %c0_i32_0 : i32, i32
  }
  func.func @transform_5(%arg0: i32) -> (i32, i32) {
    %c0_i32 = arith.constant 0 : i32
    %c0_i32_0 = arith.constant 0 : i32
    %c0_i32_1 = arith.constant 0 : i32
    return %c0_i32, %c0_i32_0 : i32, i32
  }
  func.func @transform_6(%arg0: i32) -> (i32, i32) {
    %c0_i32 = arith.constant 0 : i32
    %c0_i32_0 = arith.constant 0 : i32
    %c0_i32_1 = arith.constant 0 : i32
    return %c0_i32, %c0_i32_0 : i32, i32
  }
  func.func @transform_7(%arg0: i32) -> (i32, i32) {
    %c0_i32 = arith.constant 0 : i32
    %c0_i32_0 = arith.constant 0 : i32
    %c0_i32_1 = arith.constant 0 : i32
    return %c0_i32, %c0_i32_0 : i32, i32
  }
  func.func @transform_8(%arg0: i32) -> (i32, i32) {
    %c0_i32 = arith.constant 0 : i32
    %c0_i32_0 = arith.constant 0 : i32
    return %arg0, %c0_i32 : i32, i32
  }
}

</mosaic_0001>

<bundles_post_ra>
// kernel: tpu_custom_call.1
= control target key start
LH: loop header
LB: loop body
LE: loop exit
PB: predicated region body
PF: predicated region fallthrough
CT: control target
= control target key end

     0   :  { %13 = vsyncpa [#allocation3], 0  ;;  %s910_s0 = inlined_call_operand.hbm [shape: f32[4,128], index: 0, kind: input, shape index: {}]   ;;  %s911_s1 = inlined_call_operand.hbm [shape: f32[128,256], index: 1, kind: input, shape index: {}]   ;;  %s912_s2 = inlined_call_operand.vmem [shape: f32[1,256], index: 2, kind: input, shape index: {}]   ;;  %s913_s3 = inlined_call_operand.hbm [shape: f32[256,128], index: 3, kind: input, shape index: {}]   ;;  %s914_s4 = inlined_call_operand.vmem [shape: f32[1,128], index: 4, kind: input, shape index: {}]   ;;  %s915_s5 = inlined_call_operand.vmem [shape: f32[1,128], index: 5, kind: input, shape index: {}]   ;;  %s916_s6 = inlined_call_operand.vmem [shape: f32[1,128], index: 6, kind: input, shape index: {}]   ;;  %s917_s7 = inlined_call_operand.hbm [shape: f32[128,128], index: 7, kind: input, shape index: {}]   ;;  %s918_s8 = inlined_call_operand.hbm [shape: f32[4,128], index: 8, kind: output, shape index: {}]  }
   0x1   :  { %14 = vsyncpa [#allocation6], 0 }
   0x2   :  { %15 = vsyncpa [#allocation9], 0 }
   0x3   :  { %16 = vsyncpa [#allocation4], 0 }
   0x4   :  { %21 = vsyncadd [#allocation3], 64  ;;  %s771_s27 = smov [#allocation5]   ;;  %s653_s9 = scalar_lea.hbm %s911_s1, 4096 }
   0x5   :  { %s34_s28 = sshll.u32 %s771_s27, 4  ;;  %p654_p0 = scmp.ne.s32.totalorder %s911_s1, %s653_s9  ;;  %s35_s28 = int_to_ptr.vmem [resolvable:$true] %s34_s28 }
   0x6   :  { %p657_p1 = scmp.lt.u32.totalorder %s653_s9, %s911_s1 }
   0x8   :  { %p659_p2 = pnand %p657_p1, %p654_p0 }
   0xa   :  { %662 = shalt.err (!%p659_p2)
}
   0xb   :  { %s663_s14 = scalar_lea.vmem %s35_s28, 4096  ;;  %p668_p4 = scmp.lt.s32.totalorder %s35_s28, %s35_s28 }
   0xc   :  { %p664_p3 = scmp.ne.s32.totalorder %s35_s28, %s663_s14  ;;  %p669_p5 = scmp.lt.s32.totalorder %s663_s14, %s663_s14 }
   0xe   :  { %p670_p6 = por %p669_p5, %p668_p4 }
  0x10   :  { %p671_p7 = pnand %p670_p6, %p664_p3 }
  0x12   :  { %674 = shalt.err (!%p671_p7)
}
  0x13   :  { %s772_s15 = smov 256   ;;  %s773_s16 = smov 16  }
  0x14   :  { %40 = dma.hbm_to_vmem [thread:$0]  %s911_s1, 4096, %s35_s28, [#allocation6], %s772_s15, %s772_s15, %s773_s16  }
  0x15   :  { %s774_s19 = smov [#allocation2]   ;;  %s675_s23 = scalar_lea.hbm %s910_s0, 64 }
  0x16   :  { %s22_s20 = sshll.u32 %s774_s19, 4  ;;  %p676_p8 = scmp.ne.s32.totalorder %s910_s0, %s675_s23  ;;  %s23_s20 = int_to_ptr.vmem [resolvable:$true] %s22_s20 }
  0x17   :  { %p679_p9 = scmp.lt.u32.totalorder %s675_s23, %s910_s0 }
  0x19   :  { %p681_p10 = pnand %p679_p9, %p676_p8 }
  0x1b   :  { %684 = shalt.err (!%p681_p10)
}
  0x1c   :  { %s685_s29 = scalar_lea.vmem %s23_s20, 64  ;;  %s689_s1 = scalar_lea.vmem %s23_s20, 128 }
  0x1d   :  { %p686_p11 = scmp.ne.s32.totalorder %s23_s20, %s685_s29  ;;  %p690_p12 = scmp.lt.s32.totalorder %s23_s20, %s23_s20 }
  0x1e   :  { %p691_p13 = scmp.lt.s32.totalorder %s689_s1, %s685_s29 }
  0x20   :  { %p692_p0 = por %p691_p13, %p690_p12 }
  0x22   :  { %p693_p1 = pnand %p692_p0, %p686_p11 }
  0x24   :  { %696 = shalt.err (!%p693_p1)
}
  0x25   :  { %s775_s28 = smov 64   ;;  %s776_s30 = smov 4  }
  0x26   :  { %28 = dma.hbm_to_vmem [thread:$0]  %s910_s0, 64, %s23_s20, [#allocation3], %s775_s28, %s775_s28, %s776_s30  }
  0x27   :  { %s777_s11 = smov [#allocation7]   ;;  %s697_s15 = scalar_lea.hbm %s913_s3, 4096 }
  0x28   :  { %s48_s12 = sshll.u32 %s777_s11, 4  ;;  %p698_p2 = scmp.ne.s32.totalorder %s913_s3, %s697_s15  ;;  %s49_s12 = int_to_ptr.vmem [resolvable:$true] %s48_s12 }
  0x29   :  { %p701_p3 = scmp.lt.u32.totalorder %s697_s15, %s913_s3 }
  0x2b   :  { %p703_p4 = pnand %p701_p3, %p698_p2 }
  0x2d   :  { %706 = shalt.err (!%p703_p4)
}
  0x2e   :  { %s707_s21 = scalar_lea.vmem %s49_s12, 4096  ;;  %p712_p6 = scmp.lt.s32.totalorder %s49_s12, %s49_s12 }
  0x2f   :  { %p708_p5 = scmp.ne.s32.totalorder %s49_s12, %s707_s21  ;;  %p713_p7 = scmp.lt.s32.totalorder %s707_s21, %s707_s21 }
  0x31   :  { %p714_p8 = por %p713_p7, %p712_p6 }
  0x33   :  { %p715_p9 = pnand %p714_p8, %p708_p5 }
  0x35   :  { %718 = shalt.err (!%p715_p9)
}
  0x36   :  { %s778_s0 = smov 128   ;;  %s779_s20 = smov 8  }
  0x37   :  { %54 = dma.hbm_to_vmem [thread:$0]  %s913_s3, 4096, %s49_s12, [#allocation6], %s778_s0, %s778_s0, %s779_s20  }
  0x38   :  { %s780_s24 = smov [#allocation8]   ;;  %s719_s29 = scalar_lea.hbm %s917_s7, 2048 }
  0x39   :  { %s66_s25 = sshll.u32 %s780_s24, 4  ;;  %p720_p10 = scmp.ne.s32.totalorder %s917_s7, %s719_s29  ;;  %s67_s25 = int_to_ptr.vmem [resolvable:$true] %s66_s25 }
  0x3a   :  { %p723_p11 = scmp.lt.u32.totalorder %s719_s29, %s917_s7 }
  0x3c   :  { %p725_p12 = pnand %p723_p11, %p720_p10 }
  0x3e   :  { %728 = shalt.err (!%p725_p12)
}
  0x3f   :  { %s729_s13 = scalar_lea.vmem %s67_s25, 2048  ;;  %p734_p0 = scmp.lt.s32.totalorder %s67_s25, %s67_s25 }
  0x40   :  { %p730_p13 = scmp.ne.s32.totalorder %s67_s25, %s729_s13  ;;  %p735_p1 = scmp.lt.s32.totalorder %s729_s13, %s729_s13 }
  0x42   :  { %p736_p2 = por %p735_p1, %p734_p0 }
  0x44   :  { %p737_p3 = pnand %p736_p2, %p730_p13 }
  0x46   :  { %740 = shalt.err (!%p737_p3)
}
  0x47   :  { %72 = dma.hbm_to_vmem [thread:$0]  %s917_s7, 2048, %s67_s25, [#allocation9], %s778_s0, %s778_s0, %s779_s20  }
  0x48   :  { %763 = dma.done.wait [#allocation3], 128  }
  0x49   :  { %764 = vsyncadd [#allocation3], 4294967168 }
  0x4a   :  { %765 = dma.done.wait [#allocation6], 8192  }
  0x4b   :  { %766 = vsyncadd [#allocation6], 4294959104 }
  0x4c   :  { %767 = dma.done.wait [#allocation9], 2048  }
  0x4d   :  { %768 = vsyncadd [#allocation9], 4294965248  ;;  %v781_v0 = vmov 0.0   ;;  %v87_v1 = vld [vmem:[#allocation5 + $0x8] sm:$0xff]  ;;  %v89_v2 = vld [vmem:[#allocation5 + $0x18] sm:$0xff]  ;;  %vm783_vm0 = vmmov 0  }
  0x4e   :  { %194 = vmatprep.mubr.f32.mxu0 %v781_v0  ;;  %v86_v3 = vld [vmem:[#allocation5] sm:$0xff]  ;;  %v541_v4 = vpack.c.bf16 %v89_v2, %v87_v1  ;;  %v88_v5 = vld [vmem:[#allocation5 + $0x10] sm:$0xff]  ;;  %v91_v6 = vld [vmem:[#allocation5 + $0x28] sm:$0xff] }
  0x4f   :  { %v93_v7 = vld [vmem:[#allocation5 + $0x38] sm:$0xff]  ;;  %v543_v8 = vpack.c.bf16 %v88_v5, %v86_v3  ;;  %v90_v10 = vld [vmem:[#allocation5 + $0x20] sm:$0xff]  ;;  %v92_v11 = vld [vmem:[#allocation5 + $0x30] sm:$0xff] }
  0x50   :  { %v545_v9 = vpack.c.bf16 %v93_v7, %v91_v6  ;;  %v95_v12 = vld [vmem:[#allocation5 + $0x48] sm:$0xff]  ;;  %542 = vmatprep.subr.bf16.mxu0 %v541_v4  ;;  %v97_v13 = vld [vmem:[#allocation5 + $0x58] sm:$0xff]  ;;  %v547_v14 = vpack.c.bf16 %v92_v11, %v90_v10  ;;  %v94_v16 = vld [vmem:[#allocation5 + $0x40] sm:$0xff] }
  0x51   :  { %544 = vmatpush1.bf16.msra.mxu0 %v543_v8  ;;  %v549_v15 = vpack.c.bf16 %v97_v13, %v95_v12  ;;  %v96_v17 = vld [vmem:[#allocation5 + $0x50] sm:$0xff]  ;;  %v99_v18 = vld [vmem:[#allocation5 + $0x68] sm:$0xff]  ;;  %v101_v19 = vld [vmem:[#allocation5 + $0x78] sm:$0xff] }
  0x52   :  { %546 = vmatprep.subr.bf16.mxu0 %v545_v9  ;;  %v551_v20 = vpack.c.bf16 %v96_v17, %v94_v16  ;;  %v553_v21 = vpack.c.bf16 %v101_v19, %v99_v18  ;;  %v98_v22 = vld [vmem:[#allocation5 + $0x60] sm:$0xff]  ;;  %v100_v23 = vld [vmem:[#allocation5 + $0x70] sm:$0xff]  ;;  %v103_v24 = vld [vmem:[#allocation5 + $0x88] sm:$0xff] }
  0x53   :  { %v105_v25 = vld [vmem:[#allocation5 + $0x98] sm:$0xff]  ;;  %v555_v26 = vpack.c.bf16 %v100_v23, %v98_v22  ;;  %v102_v28 = vld [vmem:[#allocation5 + $0x80] sm:$0xff]  ;;  %v104_v29 = vld [vmem:[#allocation5 + $0x90] sm:$0xff] }
  0x54   :  { %v557_v27 = vpack.c.bf16 %v105_v25, %v103_v24  ;;  %v107_v30 = vld [vmem:[#allocation5 + $0xa8] sm:$0xff]  ;;  %v109_v31 = vld [vmem:[#allocation5 + $0xb8] sm:$0xff]  ;;  %v559_v32 = vpack.c.bf16 %v104_v29, %v102_v28  ;;  %v106_v34 = vld [vmem:[#allocation5 + $0xa0] sm:$0xff] }
  0x55   :  { %548 = vmatpush1.bf16.msra.mxu0 %v547_v14  ;;  %v561_v33 = vpack.c.bf16 %v109_v31, %v107_v30  ;;  %v108_v35 = vld [vmem:[#allocation5 + $0xb0] sm:$0xff]  ;;  %v111_v36 = vld [vmem:[#allocation5 + $0xc8] sm:$0xff]  ;;  %v113_v37 = vld [vmem:[#allocation5 + $0xd8] sm:$0xff] }
  0x56   :  { %550 = vmatprep.subr.bf16.mxu0 %v549_v15  ;;  %v563_v38 = vpack.c.bf16 %v108_v35, %v106_v34  ;;  %v565_v39 = vpack.c.bf16 %v113_v37, %v111_v36  ;;  %v110_v40 = vld [vmem:[#allocation5 + $0xc0] sm:$0xff]  ;;  %v112_v41 = vld [vmem:[#allocation5 + $0xd0] sm:$0xff]  ;;  %v115_v42 = vld [vmem:[#allocation5 + $0xe8] sm:$0xff] }
  0x57   :  { %v117_v43 = vld [vmem:[#allocation5 + $0xf8] sm:$0xff]  ;;  %v567_v44 = vpack.c.bf16 %v112_v41, %v110_v40  ;;  %v114_v46 = vld [vmem:[#allocation5 + $0xe0] sm:$0xff]  ;;  %v116_v47 = vld [vmem:[#allocation5 + $0xf0] sm:$0xff] }
  0x58   :  { %v569_v45 = vpack.c.bf16 %v117_v43, %v115_v42  ;;  %v571_v48 = vpack.c.bf16 %v116_v47, %v114_v46  ;;  %v85_v49 = vld [vmem:[#allocation2] sm:$0xff]  ;;  %v231_v50 = vld [vmem:[#allocation7 + $0x80] sm:$0xff]  ;;  %v232_v51 = vld [vmem:[#allocation7 + $0x88] sm:$0xff] }
  0x59   :  { %552 = vmatpush1.bf16.msra.mxu0 %v551_v20  ;;  %v573_v52 = vpack.c.bf16 %v232_v51, %v231_v50  ;;  %v215_v53 = vld [vmem:[#allocation7] sm:$0xff]  ;;  %v216_v54 = vld [vmem:[#allocation7 + $0x8] sm:$0xff]  ;;  %v233_v56 = vld [vmem:[#allocation7 + $0x90] sm:$0xff] }
  0x5a   :  { %554 = vmatprep.subr.bf16.mxu0 %v553_v21  ;;  %v575_v55 = vpack.c.bf16 %v216_v54, %v215_v53  ;;  %v234_v57 = vld [vmem:[#allocation7 + $0x98] sm:$0xff]  ;;  %v217_v59 = vld [vmem:[#allocation7 + $0x10] sm:$0xff]  ;;  %v235_v62 = vld [vmem:[#allocation7 + $0xa0] sm:$0xff]  ;;  %v120_v54 = vlaneseq }
  0x5b   :  { %574 = vmatprep.subr.bf16.mxu1 %v573_v52  ;;  %v577_v58 = vpack.c.bf16 %v234_v57, %v233_v56  ;;  %v218_v60 = vld [vmem:[#allocation7 + $0x18] sm:$0xff]  ;;  %v236_v63 = vld [vmem:[#allocation7 + $0xa8] sm:$0xff]  ;;  %v219_v2 = vld [vmem:[#allocation7 + $0x20] sm:$0xff] }
  0x5c   :  { %576 = vmatpush3.bf16.msra.mxu1 %v575_v55  ;;  %v579_v61 = vpack.c.bf16 %v218_v60, %v217_v59  ;;  %v581_v1 = vpack.c.bf16 %v236_v63, %v235_v62  ;;  %v220_v3 = vld [vmem:[#allocation7 + $0x28] sm:$0xff]  ;;  %v237_v5 = vld [vmem:[#allocation7 + $0xb0] sm:$0xff]  ;;  %v238_v6 = vld [vmem:[#allocation7 + $0xb8] sm:$0xff]  ;;  %v121_v55 = vshrl.u32 %v120_v54, 7 }
  0x5d   :  { %556 = vmatpush1.bf16.msra.mxu0 %v555_v26  ;;  %578 = vmatprep.subr.bf16.mxu1 %v577_v58  ;;  %v583_v4 = vpack.c.bf16 %v220_v3, %v219_v2  ;;  %v585_v7 = vpack.c.bf16 %v238_v6, %v237_v5  ;;  %v221_v8 = vld [vmem:[#allocation7 + $0x30] sm:$0xff]  ;;  %v222_v9 = vld [vmem:[#allocation7 + $0x38] sm:$0xff]  ;;  %v239_v11 = vld [vmem:[#allocation7 + $0xc0] sm:$0xff] }
  0x5e   :  { %558 = vmatprep.subr.bf16.mxu0 %v557_v27  ;;  %v587_v10 = vpack.c.bf16 %v222_v9, %v221_v8  ;;  %v240_v12 = vld [vmem:[#allocation7 + $0xc8] sm:$0xff]  ;;  %v223_v14 = vld [vmem:[#allocation7 + $0x40] sm:$0xff]  ;;  %v241_v17 = vld [vmem:[#allocation7 + $0xd0] sm:$0xff]  ;;  %v122_v56 = vsub.s32 0, %v121_v55  ;;  %v126_v58 = vsub.s32 1, %v121_v55 }
  0x5f   :  { %v589_v13 = vpack.c.bf16 %v240_v12, %v239_v11  ;;  %v224_v15 = vld [vmem:[#allocation7 + $0x48] sm:$0xff]  ;;  %v242_v18 = vld [vmem:[#allocation7 + $0xd8] sm:$0xff]  ;;  %v225_v20 = vld [vmem:[#allocation7 + $0x50] sm:$0xff] }
  0x60   :  { %580 = vmatpush3.bf16.msra.mxu1 %v579_v61  ;;  %v591_v16 = vpack.c.bf16 %v224_v15, %v223_v14  ;;  %v593_v19 = vpack.c.bf16 %v242_v18, %v241_v17  ;;  %v226_v21 = vld [vmem:[#allocation7 + $0x58] sm:$0xff]  ;;  %v243_v23 = vld [vmem:[#allocation7 + $0xe0] sm:$0xff]  ;;  %v244_v24 = vld [vmem:[#allocation7 + $0xe8] sm:$0xff] }
  0x61   :  { %560 = vmatpush1.bf16.msra.mxu0 %v559_v32  ;;  %582 = vmatprep.subr.bf16.mxu1 %v581_v1  ;;  %v595_v22 = vpack.c.bf16 %v226_v21, %v225_v20  ;;  %v597_v25 = vpack.c.bf16 %v244_v24, %v243_v23  ;;  %v227_v26 = vld [vmem:[#allocation7 + $0x60] sm:$0xff]  ;;  %v228_v27 = vld [vmem:[#allocation7 + $0x68] sm:$0xff]  ;;  %v245_v29 = vld [vmem:[#allocation7 + $0xf0] sm:$0xff] }
  0x62   :  { %562 = vmatprep.subr.bf16.mxu0 %v561_v33  ;;  %v599_v28 = vpack.c.bf16 %v228_v27, %v227_v26  ;;  %v246_v30 = vld [vmem:[#allocation7 + $0xf8] sm:$0xff]  ;;  %v229_v32 = vld [vmem:[#allocation7 + $0x70] sm:$0xff]  ;;  %v325_v35 = vld [vmem:[#allocation8] sm:$0xff] }
  0x63   :  { %v601_v31 = vpack.c.bf16 %v246_v30, %v245_v29  ;;  %v230_v33 = vld [vmem:[#allocation7 + $0x78] sm:$0xff]  ;;  %v326_v36 = vld [vmem:[#allocation8 + $0x8] sm:$0xff]  ;;  %v327_v37 = vld [vmem:[#allocation8 + $0x10] sm:$0xff] }
  0x64   :  { %584 = vmatpush3.bf16.msra.mxu1 %v583_v4  ;;  %v603_v34 = vpack.c.bf16 %v230_v33, %v229_v32  ;;  %v328_v40 = vld [vmem:[#allocation8 + $0x18] sm:$0xff]  ;;  %v329_v42 = vld [vmem:[#allocation8 + $0x20] sm:$0xff]  ;;  %v330_v43 = vld [vmem:[#allocation8 + $0x28] sm:$0xff] }
  0x65   :  { %564 = vmatpush1.bf16.msra.mxu0 %v563_v38  ;;  %586 = vmatprep.subr.bf16.mxu1 %v585_v7  ;;  %v782_v38 = vmov 0.0|0.0   ;;  %v609_v41 = vpack.c.bf16 %v328_v40, %v327_v37  ;;  %v332_v46 = vld [vmem:[#allocation8 + $0x38] sm:$0xff]  ;;  %v335_v51 = vld [vmem:[#allocation8 + $0x50] sm:$0xff]  ;;  %v337_v12 = vld [vmem:[#allocation8 + $0x60] sm:$0xff] }
  0x66   :  { %566 = vmatprep.subr.bf16.mxu0 %v565_v39  ;;  %v606_v39 = vpack.c.bf16 %v326_v36, %v325_v35  ;;  %v336_v52 = vld [vmem:[#allocation8 + $0x58] sm:$0xff]  ;;  %v339_v15 = vld [vmem:[#allocation8 + $0x70] sm:$0xff] }
  0x67   :  { %v621_v53 = vpack.c.bf16 %v336_v52, %v335_v51  ;;  %v118_v57 = vld [vmem:[%s912_s2] sm:$0x3] }
  0x68   :  { %588 = vmatpush3.bf16.msra.mxu1 %v587_v10  ;;  %v123_v59 = vrot.slane %v118_v57, %v122_v56  ;;  %v127_v60 = vrot.slane %v118_v57, %v126_v58  ;;  %v453_v29 = vld [vmem:[%s916_s6] ss:$0 sm:$0xff] }
  0x69   :  { %568 = vmatpush1.bf16.msra.mxu0 %v567_v44  ;;  %590 = vmatprep.subr.bf16.mxu1 %v589_v13  ;;  %v612_v44 = vpack.c.bf16 %v330_v43, %v329_v42  ;;  %v338_v13 = vld [vmem:[#allocation8 + $0x68] sm:$0xff] }
  0x6a   :  { %570 = vmatprep.subr.bf16.mxu0 %v569_v45  ;;  %v331_v45 = vld [vmem:[#allocation8 + $0x30] sm:$0xff]  ;;  %v624_v14 = vpack.c.bf16 %v338_v13, %v337_v12 }
  0x6b   :  { %v615_v47 = vpack.c.bf16 %v332_v46, %v331_v45 }
  0x6c   :  { %592 = vmatpush3.bf16.msra.mxu1 %v591_v16  ;;  %v340_v16 = vld [vmem:[#allocation8 + $0x78] sm:$0xff] }
  0x6d   :  { %572 = vmatpush1.bf16.msra.mxu0 %v571_v48  ;;  %594 = vmatprep.subr.bf16.mxu1 %v593_v19  ;;  %v333_v48 = vld [vmem:[#allocation8 + $0x40] sm:$0xff]  ;;  %v627_v17 = vpack.c.bf16 %v340_v16, %v339_v15  ;;  %v451_v19 = vld [vmem:[%s914_s4] ss:$0 sm:$0xff] }
  0x6e   :  { %605 = vmatprep.subr.bf16.mxu0 %v782_v38 }
  0x70   :  { %195 = vmatmul.mubr.f32.vlgmr.msra.gmra.mrb[0].mxu0 %v85_v49  ;;  %596 = vmatpush3.bf16.msra.mxu1 %v595_v22  ;;  %v334_v49 = vld [vmem:[#allocation8 + $0x48] sm:$0xff] }
  0x71   :  { %598 = vmatprep.subr.bf16.mxu1 %v597_v25  ;;  %607 = vmatpush3.bf16.msra.mxu0 %v606_v39  ;;  %v618_v50 = vpack.c.bf16 %v334_v49, %v333_v48 }
  0x72   :  { %608 = vmatprep.subr.bf16.mxu0 %v782_v38  ;;  %538 = vmatprep.mubr.msk.f32.mxu0 %vm783_vm0, %v781_v0 }
  0x74   :  { %600 = vmatpush3.bf16.msra.mxu1 %v599_v28  ;;  %v452_v28 = vld [vmem:[%s915_s5] ss:$0 sm:$0xff] }
  0x75   :  { %602 = vmatprep.subr.bf16.mxu1 %v601_v31  ;;  %610 = vmatpush3.bf16.msra.mxu0 %v609_v41 }
  0x76   :  { %611 = vmatprep.subr.bf16.mxu0 %v782_v38 }
  0x78   :  { %604 = vmatpush3.bf16.msra.mxu1 %v603_v34 }
  0x79   :  { %613 = vmatpush3.bf16.msra.mxu0 %v612_v44 }
  0x7a   :  { %614 = vmatprep.subr.bf16.mxu0 %v782_v38 }
  0x7d   :  { %616 = vmatpush3.bf16.msra.mxu0 %v615_v47 }
  0x7e   :  { %617 = vmatprep.subr.bf16.mxu0 %v782_v38 }
  0x81   :  { %619 = vmatpush3.bf16.msra.mxu0 %v618_v50 }
  0x82   :  { %620 = vmatprep.subr.bf16.mxu0 %v782_v38 }
  0x85   :  { %622 = vmatpush3.bf16.msra.mxu0 %v621_v53 }
  0x86   :  { %623 = vmatprep.subr.bf16.mxu0 %v782_v38 }
  0x89   :  { %625 = vmatpush3.bf16.msra.mxu0 %v624_v14 }
  0x8a   :  { %626 = vmatprep.subr.bf16.mxu0 %v782_v38 }
  0x8d   :  { %628 = vmatpush3.bf16.msra.mxu0 %v627_v17 }
 0x143   :  { %v196_v61 = vpop.f32.mrb[0].mxu0 }
 0x144   :  { %v197_v62 = vadd.f32 %v196_v61, %v123_v59  ;;  %v198_v63 = vpop.f32.mrb[1].mxu0 }
 0x145   :  { %v199_v1 = vadd.f32 %v198_v63, %v127_v60 }
 0x146   :  { %v449_v2 = vmul.f32 -1.442695, %v197_v62 }
 0x147   :  { %v450_v3 = vmul.f32 -1.442695, %v199_v1 }
 0x148   :  { %643 = vpow2.f32 %v449_v2 }
 0x149   :  { %645 = vpow2.f32 %v450_v3 }
 0x152   :  { %v644_v4 = vpop.eup %643 }
 0x153   :  { %v646_v5 = vpop.eup %645  ;;  %v207_v6 = vadd.f32 1.0, %v644_v4 }
 0x154   :  { %v208_v7 = vadd.f32 1.0, %v646_v5 }
 0x155   :  { %647 = vrcp.f32 %v207_v6 }
 0x156   :  { %649 = vrcp.f32 %v208_v7 }
 0x15f   :  { %v648_v8 = vpop.eup %647 }
 0x160   :  { %v650_v9 = vpop.eup %649  ;;  %v213_v11 = vmul.f32 %v648_v8, %v197_v62 }
 0x161   :  { %v214_v10 = vmul.f32 %v650_v9, %v199_v1 }
 0x163   :  { %318 = vmatprep.mubr.f32.mxu1 %v214_v10 }
 0x164   :  { %319 = vmatmul.mubr.f32.vlgmr.msra.gmra.mrb[0].mxu1 %v213_v11 }
 0x237   :  { %v486_v18 = vpop.f32.mrb[0].mxu1 }
 0x238   :  { %v487_v20 = vpop.f32.mrb[1].mxu1 }
 0x239   :  { %v488_v21 = vadd.f32 %v487_v20, %v486_v18 }
 0x23b   :  { %v321_v22 = vadd.f32 %v488_v21, %v451_v19 }
 0x23d   :  { %v324_v23 = vmul.f32 %v321_v22, %v321_v22 }
 0x23f   :  { %539 = vmatmul.mubr.f32.vlgmr.msra.gmra.mrb[2].mxu0 %v324_v23 }
 0x312   :  { %v407_v24 = vpop.f32.mrb[2].mxu0 }
 0x313   :  { %v408_v25 = vadd.f32 1e-05, %v407_v24  ;;  %v540_v26 = vpop.f32.mrb[3].mxu0 }
 0x315   :  { %651 = vrsqrt.f32 %v408_v25 }
 0x31f   :  { %v652_v27 = vpop.eup %651 }
 0x320   :  { %v412_v0 = vmul.f32 %v652_v27, %v321_v22 }
 0x322   :  { %v420_v30 = vmul.f32 %v452_v28, %v412_v0 }
 0x324   :  { %v428_v31 = vadd.f32 %v453_v29, %v420_v30 }
 0x326   :  { %429 = vst [vmem:[#allocation10] sm:$0xff] %v428_v31 }
 0x327   :  { %434 = vsyncadd [#allocation4], 64  ;;  %s784_s4 = smov [#allocation10]  }
 0x328   :  { %s435_s21 = sshll.u32 %s784_s4, 4  ;;  %s436_s21 = int_to_ptr.vmem [resolvable:$true] %s435_s21 }
 0x329   :  { %s741_s0 = scalar_lea.vmem %s436_s21, 64  ;;  %s745_s20 = scalar_lea.vmem %s436_s21, 128 }
 0x32a   :  { %p742_p4 = scmp.ne.s32.totalorder %s436_s21, %s741_s0  ;;  %p746_p5 = scmp.lt.s32.totalorder %s436_s21, %s436_s21 }
 0x32b   :  { %p747_p6 = scmp.lt.s32.totalorder %s745_s20, %s741_s0 }
 0x32d   :  { %p748_p7 = por %p747_p6, %p746_p5 }
 0x32f   :  { %p749_p8 = pnand %p748_p7, %p742_p4 }
 0x331   :  { %752 = shalt.err (!%p749_p8)
}
 0x332   :  { %s753_s23 = scalar_lea.hbm %s918_s8, 64 }
 0x333   :  { %p754_p9 = scmp.ne.s32.totalorder %s918_s8, %s753_s23  ;;  %p757_p10 = scmp.lt.u32.totalorder %s753_s23, %s918_s8 }
 0x335   :  { %p759_p11 = pnand %p757_p10, %p754_p9 }
 0x337   :  { %762 = shalt.err (!%p759_p11)
}
 0x338   :  { %441 = dma.vmem_to_hbm [thread:$0]  %s436_s21, 64, %s918_s8, [#allocation4], %s775_s28, %s775_s28, %s776_s30  }
 0x339   :  { %769 = dma.done.wait [#allocation4], 128  }
 0x33a   :  { %770 = vsyncadd [#allocation4], 4294967168 }
 0x33b   :  { %445 = vsyncpa [#allocation3], 1 }
 0x33c   :  { %446 = vsyncpa [#allocation6], 1 }
 0x33d   :  { %447 = vsyncpa [#allocation9], 1 }
 0x33e   :  { %448 = vsyncpa [#allocation4], 1 }

</bundles_post_ra>
